<compile_context>
chip_gen: v7x
topology: tpu7x:2x2x1
jax: 0.10.0
libtpu: 0.0.40
codegen_flags: <defaults>
</compile_context>

<pallas_src>
import jax
import jax.numpy as jnp
from jax.experimental import pallas as pl
from jax.experimental.pallas import tpu as pltpu


def _decode_kernel(x_ref, scale_ref, off_ref, o_ref):
    """Decode one batch element.

    x_ref:     VMEM (1, A, attrs, HW) raw predictions.
    scale_ref: VMEM (A, attrs, 1)  per-(anchor, attr) multiplicative scale
               (stride_w, stride_h, anchor_w_px, anchor_h_px, 1, 1, ...).
    off_ref:   VMEM (1, attrs, HW) per-pixel additive offset
               (grid_x*stride_w, grid_y*stride_h, 0, 0, ...).
    o_ref:     VMEM (1, A, attrs, HW) decoded output.
    """
    pred = x_ref[0]                                           # (A, attrs, HW)

    # Row (attribute) index along the sublane dim; rows 2:4 use exp (w, h),
    # every other row uses sigmoid.  Dense whole-slab select keeps VPU/EUP
    # vregs fully packed and the store unmasked.
    row = jax.lax.broadcasted_iota(jnp.int32, pred.shape, dimension=1)
    is_wh = jnp.logical_and(row >= 2, row < 4)
    act = jnp.where(is_wh, jnp.exp(pred), jax.nn.sigmoid(pred))

    o_ref[0] = act * scale_ref[...] + off_ref[...]


def decode_box(x, anchors, num_classes, img_size):
    """Pallas implementation of DecodeBox.forward.

    x:        (B, A*(5+num_classes), H, W) float32   (NCHW like PyTorch)
    anchors:  (A, 2) float32 anchor (w, h) in image pixels
    img_size: (img_w, img_h)
    returns:  (B, A*H*W, 5+num_classes) float32
    """
    B, C, H, W = x.shape
    anchors = jnp.asarray(anchors, jnp.float32)
    A = anchors.shape[0]
    attrs = 5 + num_classes
    assert C == A * attrs
    HW = H * W

    stride_h = img_size[1] / H
    stride_w = img_size[0] / W

    # Per-(anchor, attr) multiplicative scale, shape (A, attrs, 1).
    # Rows 0/1: stride; rows 2/3: anchors in pixels (== scaled_anchor*stride);
    # rows 4..: 1 (conf / class probs pass through).
    scale = jnp.ones((A, attrs), jnp.float32)
    scale = scale.at[:, 0].set(stride_w)
    scale = scale.at[:, 1].set(stride_h)
    scale = scale.at[:, 2].set(anchors[:, 0])
    scale = scale.at[:, 3].set(anchors[:, 1])
    scale = scale[:, :, None]                                  # (A, attrs, 1)

    # Additive per-pixel offset, shape (1, attrs, HW).  Rows 0/1 hold the
    # stride-scaled pixel grid (row-major over H, W); everything else is 0.
    gx = jnp.tile(jnp.arange(W, dtype=jnp.float32), H) * jnp.float32(stride_w)
    gy = jnp.repeat(jnp.arange(H, dtype=jnp.float32), W) * jnp.float32(stride_h)
    off = jnp.zeros((attrs, HW), jnp.float32)
    off = off.at[0].set(gx)
    off = off.at[1].set(gy)
    off = off[None]                                            # (1, attrs, HW)

    # Pure view: (B, A, attrs, H*W)
    x_view = x.reshape(B, A, attrs, HW)

    # VMEM footprint per step (double-buffered in+out): ~4 * A*attrs*HW*4 B;
    # for the largest YOLOv3 head (3, 85, 52*52) that is ~11 MiB — safely
    # inside the default scoped limit on v5e/v6e/v7x.
    out = pl.pallas_call(
        _decode_kernel,
        out_shape=jax.ShapeDtypeStruct((B, A, attrs, HW), jnp.float32),
        grid=(B,),
        in_specs=[
            pl.BlockSpec((1, A, attrs, HW), lambda b: (b, 0, 0, 0)),  # preds
            pl.BlockSpec((A, attrs, 1), lambda b: (0, 0, 0)),         # scale
            pl.BlockSpec((1, attrs, HW), lambda b: (0, 0, 0)),        # offsets
        ],
        out_specs=pl.BlockSpec((1, A, attrs, HW), lambda b: (b, 0, 0, 0)),
        compiler_params=pltpu.CompilerParams(
            dimension_semantics=("parallel",)),
    )(x_view, scale, off)

    # (B, A, attrs, HW) -> (B, A, HW, attrs) -> (B, A*HW, attrs).
    # TODO(synk): if the downstream consumer can take (B, A, attrs, HW), drop
    # this XLA transpose to remove one full HBM pass over the output.
    return jnp.transpose(out, (0, 1, 3, 2)).reshape(B, A * HW, attrs)


def decode_box_ref(x, anchors, num_classes, img_size):
    """Pure-JAX reference mirroring the PyTorch forward."""
    B, C, H, W = x.shape
    A = anchors.shape[0]
    attrs = 5 + num_classes
    stride_h = img_size[1] / H
    stride_w = img_size[0] / W
    scaled = anchors / jnp.array([stride_w, stride_h], dtype=jnp.float32)

    pred = x.reshape(B, A, attrs, H, W).transpose(0, 1, 3, 4, 2)  # (B,A,H,W,attrs)
    sx = jax.nn.sigmoid(pred[..., 0])
    sy = jax.nn.sigmoid(pred[..., 1])
    tw = pred[..., 2]
    th = pred[..., 3]
    conf = jax.nn.sigmoid(pred[..., 4])
    cls = jax.nn.sigmoid(pred[..., 5:])

    gx = jnp.arange(W, dtype=jnp.float32)[None, None, None, :]
    gy = jnp.arange(H, dtype=jnp.float32)[None, None, :, None]
    aw = scaled[:, 0][None, :, None, None]
    ah = scaled[:, 1][None, :, None, None]

    bx = sx + gx
    by = sy + gy
    bw = jnp.exp(tw) * aw
    bh = jnp.exp(th) * ah
    boxes = jnp.stack([bx, by, bw, bh], axis=-1) * jnp.array(
        [stride_w, stride_h, stride_w, stride_h], dtype=jnp.float32)

    return jnp.concatenate(
        [boxes.reshape(B, -1, 4),
         conf.reshape(B, -1, 1),
         cls.reshape(B, -1, num_classes)], axis=-1)


if __name__ == "__main__":
    num_classes = 3
    anchors = jnp.array([[10.0, 13.0], [16.0, 30.0], [33.0, 23.0]],
                        dtype=jnp.float32)
    A = anchors.shape[0]
    attrs = 5 + num_classes
    key = jax.random.PRNGKey(0)

    # Case 1: small power-of-two feature map (16x16, img 128x128).
    B, H, W = 2, 16, 16
    img_size = (128, 128)
    x = jax.random.normal(key, (B, A * attrs, H, W), dtype=jnp.float32)
    out = jax.block_until_ready(decode_box(x, anchors, num_classes, img_size))
    ref = decode_box_ref(x, anchors, num_classes, img_size)
    assert out.shape == (B, A * H * W, attrs), out.shape
    assert jnp.allclose(out, ref, atol=1e-5, rtol=1e-5), "mismatch (16x16)"

    # Case 2: real YOLOv3-style odd feature map (13x13, img 416x416) — checks
    # that the relaxed H*W constraint works (full-dim blocks, no 128 padding
    # requirement).
    B2, H2, W2 = 2, 13, 13
    img_size2 = (416, 416)
    x2 = jax.random.normal(jax.random.PRNGKey(1),
                           (B2, A * attrs, H2, W2), dtype=jnp.float32)
    out2 = jax.block_until_ready(
        decode_box(x2, anchors, num_classes, img_size2))
    ref2 = decode_box_ref(x2, anchors, num_classes, img_size2)
    assert out2.shape == (B2, A * H2 * W2, attrs), out2.shape
    assert jnp.allclose(out2, ref2, atol=1e-5, rtol=1e-5), "mismatch (13x13)"

    print("KERNEL_OK")
</pallas_src>

<mosaic_0001>
module attributes {stable_mosaic.version = 11 : i64} {
  func.func @_decode_kernel(%arg0: i32, %arg1: memref<1x3x8x256xf32, #tpu.memory_space<vmem>>, %arg2: memref<3x8x1xf32, #tpu.memory_space<vmem>>, %arg3: memref<1x8x256xf32, #tpu.memory_space<vmem>>, %arg4: memref<1x3x8x256xf32, #tpu.memory_space<vmem>>) attributes {dimension_semantics = [#tpu.dimension_semantics<parallel>], iteration_bounds = array<i64: 2>, scalar_prefetch = 0 : i64, scratch_operands = 0 : i64, tpu.core_type = #tpu.core_type<tc>, window_params = [{transform_indices = @transform_0, window_bounds = array<i64: 1, 3, 8, 256>}, {pipeline_mode = #tpu.pipeline_mode<synchronous>, transform_indices = @transform_1, window_bounds = array<i64: 3, 8, 1>}, {pipeline_mode = #tpu.pipeline_mode<synchronous>, transform_indices = @transform_2, window_bounds = array<i64: 1, 8, 256>}, {transform_indices = @transform_3, window_bounds = array<i64: 1, 3, 8, 256>}]} {
    %c0 = arith.constant 0 : index
    %c0_0 = arith.constant 0 : index
    %c0_1 = arith.constant 0 : index
    %c0_2 = arith.constant 0 : index
    %0 = vector.load %arg1[%c0, %c0_0, %c0_1, %c0_2] : memref<1x3x8x256xf32, #tpu.memory_space<vmem>>, vector<1x3x8x256xf32>
    %1 = vector.shape_cast %0 : vector<1x3x8x256xf32> to vector<3x8x256xf32>
    %2 = tpu.iota {dimensions = array<i32: 1>} : vector<3x8x256xi32>
    %c2_i32 = arith.constant 2 : i32
    %3 = vector.broadcast %c2_i32 : i32 to vector<3x8x256xi32>
    %4 = arith.cmpi sge, %2, %3 : vector<3x8x256xi32>
    %c4_i32 = arith.constant 4 : i32
    %5 = vector.broadcast %c4_i32 : i32 to vector<3x8x256xi32>
    %6 = arith.cmpi slt, %2, %5 : vector<3x8x256xi32>
    %7 = arith.andi %4, %6 : vector<3x8x256xi1>
    %8 = math.exp %1 : vector<3x8x256xf32>
    %9 = arith.negf %1 : vector<3x8x256xf32>
    %10 = math.exp %9 : vector<3x8x256xf32>
    %cst = arith.constant 1.000000e+00 : f32
    %11 = vector.broadcast %cst : f32 to vector<3x8x256xf32>
    %12 = arith.addf %11, %10 : vector<3x8x256xf32>
    %13 = arith.divf %11, %12 : vector<3x8x256xf32>
    %14 = arith.select %7, %8, %13 : vector<3x8x256xi1>, vector<3x8x256xf32>
    %c0_3 = arith.constant 0 : index
    %c0_4 = arith.constant 0 : index
    %c0_5 = arith.constant 0 : index
    %15 = vector.load %arg2[%c0_3, %c0_4, %c0_5] : memref<3x8x1xf32, #tpu.memory_space<vmem>>, vector<3x8x1xf32>
    %16 = vector.broadcast %15 : vector<3x8x1xf32> to vector<3x8x256xf32>
    %17 = arith.mulf %14, %16 : vector<3x8x256xf32>
    %c0_6 = arith.constant 0 : index
    %c0_7 = arith.constant 0 : index
    %c0_8 = arith.constant 0 : index
    %18 = vector.load %arg3[%c0_6, %c0_7, %c0_8] : memref<1x8x256xf32, #tpu.memory_space<vmem>>, vector<1x8x256xf32>
    %19 = vector.broadcast %18 : vector<1x8x256xf32> to vector<3x8x256xf32>
    %20 = arith.addf %17, %19 : vector<3x8x256xf32>
    %c0_9 = arith.constant 0 : index
    %c0_10 = arith.constant 0 : index
    %c0_11 = arith.constant 0 : index
    %c0_12 = arith.constant 0 : index
    %21 = vector.load %arg4[%c0_9, %c0_10, %c0_11, %c0_12] : memref<1x3x8x256xf32, #tpu.memory_space<vmem>>, vector<1x3x8x256xf32>
    %22 = vector.shape_cast %21 : vector<1x3x8x256xf32> to vector<3x8x256xf32>
    %23 = vector.shape_cast %20 : vector<3x8x256xf32> to vector<1x3x8x256xf32>
    tpu.vector_store %arg4[%c0_9, %c0_10, %c0_11, %c0_12], %23 {strides = array<i32>} : memref<1x3x8x256xf32, #tpu.memory_space<vmem>>, vector<1x3x8x256xf32>,
    return
  }
  func.func @transform_0(%arg0: i32) -> (i32, i32, i32, i32) {
    %c0_i32 = arith.constant 0 : i32
    %c0_i32_0 = arith.constant 0 : i32
    %c0_i32_1 = arith.constant 0 : i32
    %c0_i32_2 = arith.constant 0 : i32
    return %arg0, %c0_i32, %c0_i32_0, %c0_i32_1 : i32, i32, i32, i32
  }
  func.func @transform_1(%arg0: i32) -> (i32, i32, i32) {
    %c0_i32 = arith.constant 0 : i32
    %c0_i32_0 = arith.constant 0 : i32
    %c0_i32_1 = arith.constant 0 : i32
    %c0_i32_2 = arith.constant 0 : i32
    return %c0_i32, %c0_i32_0, %c0_i32_1 : i32, i32, i32
  }
  func.func @transform_2(%arg0: i32) -> (i32, i32, i32) {
    %c0_i32 = arith.constant 0 : i32
    %c0_i32_0 = arith.constant 0 : i32
    %c0_i32_1 = arith.constant 0 : i32
    %c0_i32_2 = arith.constant 0 : i32
    return %c0_i32, %c0_i32_0, %c0_i32_1 : i32, i32, i32
  }
  func.func @transform_3(%arg0: i32) -> (i32, i32, i32, i32) {
    %c0_i32 = arith.constant 0 : i32
    %c0_i32_0 = arith.constant 0 : i32
    %c0_i32_1 = arith.constant 0 : i32
    %c0_i32_2 = arith.constant 0 : i32
    return %arg0, %c0_i32, %c0_i32_0, %c0_i32_1 : i32, i32, i32, i32
  }
}

</mosaic_0001>

<bundles_post_ra>
// kernel: tpu_custom_call.1
= control target key start
LH: loop header
LB: loop body
LE: loop exit
PB: predicated region body
PF: predicated region fallthrough
CT: control target
= control target key end

     0   :  { %8 = vsyncpa [#allocation3], 0  ;;  %s802_s0 = inlined_call_operand.hbm [shape: f32[2,3,8,256], index: 0, kind: input, shape index: {}]   ;;  %s803_s1 = inlined_call_operand.vmem [shape: f32[3,8,1], index: 1, kind: input, shape index: {}]   ;;  %s804_s2 = inlined_call_operand.vmem [shape: f32[1,8,256], index: 2, kind: input, shape index: {}]   ;;  %s805_s3 = inlined_call_operand.hbm [shape: f32[2,3,8,256], index: 3, kind: output, shape index: {}]  }
   0x1   :  { %10 = vsyncpa [#allocation3 + $0x1], 0 }
   0x2   :  { %11 = vsyncpa [#allocation4], 0 }
   0x3   :  { %13 = vsyncpa [#allocation4 + $0x1], 0  ;;  %s611_s12 = smov 0   ;;  %s613_s13 = smov 0  }
   0x4   :  { %s615_s14 = smov 0   ;;  %s617_s15 = smov 0  }
   0x5 LB: > { %s632_s16 = sadd.s32 4294967295, %s582_s15   ;;  %s379_s17 = sadd.s32 4294967294, %s582_s15   ;;  %s582_s15 = sphi %s617_s15, %s819_s15   ;;  %s578_s14 = sphi %s615_s14, %s818_s14   ;;  %s574_s13 = sphi %s613_s13, %s817_s13   ;;  %s570_s12 = sphi %s611_s12, %s816_s12  }
   0x6   : > { %s636_s18 = sadd.s32 1, %s582_s15   ;;  %s26_s19 = sadd.s32 1, %s578_s14 }
   0x7   : > { %s23_s20 = ssub.s32 %s582_s15, %s636_s18  ;;  %p33_p0 = scmp.ne.s32.totalorder %s578_s14, %s574_s13 }
   0x8   : > { %p24_p1 = scmp.eq.s32.totalorder %s23_s20, 0  ;;  %p34_p2 = scmp.eq.s32.totalorder %s582_s15, 0 }
   0x9   : > { %p39_p3 = scmp.ne.s32.totalorder %s574_s13, %s570_s12  ;;  %p40_p4 = scmp.eq.s32.totalorder %s632_s16, 0 }
   0xa   : > { %s648_s21 = scalar_select %p24_p1, %s578_s14, %s26_s19  }
   0xb   : > { %p35_p5 = por %p34_p2, %p33_p0  ;;  %p650_p6 = por %p40_p4, %p39_p3 }
   0xc   : > { %p105_p7 = scmp.eq.s32.totalorder %s632_s16, 1  ;;  %p111_p8 = scmp.eq.s32.totalorder %s379_s17, 1 }
   0xd   : > { %p409_p10 = scmp.lt.s32.totalorder %s582_s15, 2  ;;  %s137_s25 = sand.u32 1, %s578_s14  }
   0xe   : > { %p657_p11 = por %p105_p7, %p33_p0  ;;  %p661_p12 = por %p111_p8, %p39_p3 }
   0xf   : > { %s394_s26 = smul.u32 768, %s582_s15  ;;  %p672_p13 = pnand %p409_p10, %p35_p5 }
  0x10   : > { %s808_s23 = scalar_select %p657_p11, 1, 0 }
  0x11   : > { %s809_s24 = scalar_select %p661_p12, 1, 0 }
  0x12   : > { %s393_s27 = smul.u32 48, %s137_s25  ;;  %s670_s30 = scalar_lea.hbm %s802_s0, %s394_s26 }
  0x13   : > { %s678_s7 = scalar_lea.sflag [#allocation3], %s137_s25  ;;  %s486_s8 = scalar_lea.hbm %s670_s30, 768 }
  0x14   : > { %s141_s5 = scalar_lea.vmem [#allocation2], %s393_s27  ;;  %p487_p0 = scmp.ne.s32.totalorder %s670_s30, %s486_s8 }
  0x15   : > { %s148_s6 = sshll.u32 %s141_s5, 4  ;;  %p488_p1 = pneg %p672_p13  ;;  %s676_s6 = int_to_ptr.vmem [resolvable:$true] %s148_s6 }
  0x16   : > { %s491_s11 = scalar_lea.hbm %s802_s0, 1536  ;;  %p492_p4 = scmp.lt.u32.totalorder %s670_s30, %s802_s0 }
  0x17   : > { %p489_p2 = pnand %p488_p1, %p487_p0  ;;  %p493_p5 = scmp.lt.u32.totalorder %s491_s11, %s486_s8 }
  0x18   : > { %p495_p8 = scmp.lt.u32.totalorder %s486_s8, %s670_s30 }
  0x19   : > { %p490_p3 = pneg %p489_p2  ;;  %p494_p7 = por %p493_p5, %p492_p4 }
  0x1b   : > { %p496_p10 = por %p495_p8, %p494_p7 }
  0x1d   : > { %p497_p9 = pnand %p496_p10, %p490_p3 }
  0x1f   : > { %500 = shalt.err (!%p497_p9)
}
  0x20   : > { %s501_s20 = scalar_lea.vmem %s676_s6, 768  ;;  %s584_s25 = smov [#allocation2]  }
  0x21   : > { %p502_p0 = scmp.ne.s32.totalorder %s676_s6, %s501_s20  ;;  %s506_s26 = sshll.u32 %s584_s25, 4  ;;  %s507_s26 = int_to_ptr.vmem [resolvable:$false] %s506_s26 }
  0x22   : > { %s508_s27 = scalar_lea.vmem %s507_s26, 1536  ;;  %p509_p11 = scmp.lt.s32.totalorder %s676_s6, %s507_s26 }
  0x23   : > { %p504_p2 = pnand %p502_p0, %p488_p1  ;;  %p510_p4 = scmp.lt.s32.totalorder %s508_s27, %s501_s20 }
  0x25   : > { %p505_p12 = pneg %p504_p2  ;;  %p511_p5 = por %p510_p4, %p509_p11 }
  0x27   : > { %p512_p7 = pnand %p511_p5, %p505_p12 }
  0x29   : > { %515 = shalt.err (!%p512_p7)
}
  0x2a   : > { %s585_s28 = smov 256   ;;  %s586_s29 = smov 16  }
  0x2b   : > { %404 = dma.hbm_to_vmem [thread:$0]  (!%p672_p13), %s670_s30, 768, %s676_s6, %s678_s7, %s585_s28, %s585_s28, %s586_s29  }
  0x2c   : > { %p383_p9 = scmp.ge.s32.totalorder %s582_s15, 1  ;;  %p156_p1 = scmp.lt.s32.totalorder %s582_s15, 3 }
  0x2e   : > { %p157_p3 = pnand %p383_p9, %p156_p1 }
  0x2f   : > { %s709_s5 = sand.u32 (!%p157_p3), 1, %s574_s13  }
  0x30   : > { %160 = sbr.rel (%p157_p3) target bundleno = 209 (0xd1), region = 32  ;;  %s163_s9 = scalar_lea.sflag (!%p157_p3), [#allocation3], %s709_s5 }
  0x31   : > { %s395_s8 = smul.u32 (!%p157_p3), 48, %s709_s5 }
  0x33   : > { %s166_s10 = scalar_lea.vmem (!%p157_p3), [#allocation2], %s395_s8 }
  0x37   : > { %561 = dma.done.wait (%p650_p6), %s163_s9, 768  }
  0x38   : > { %563 = vsyncadd (%p650_p6), %s163_s9, 4294966528  ;;  %v587_v0 = vmov 0   ;;  %v254_v1 = vld [vmem:[%s803_s1] sm:$0xff]  ;;  %v256_v2 = vld [vmem:[%s803_s1 + $0x10] sm:$0xff]  ;;  %v195_v32 = vlaneseq  ;;  %s188_s26 = scalar_lea.vmem [#allocation5], %s395_s8  ;;  %s396_s28 = smul.u32 768, %s632_s16 }
  0x39   : > { %448 = vset.pattern.permute.xlu0 %v587_v0  ;;  %449 = vset.pattern.permute.xlu1 %v587_v0  ;;  %v255_v3 = vld [vmem:[%s803_s1 + $0x8] sm:$0xff]  ;;  %v189_v4 = vld [vmem:[%s166_s10] sm:$0xff]  ;;  %v191_v12 = vld [vmem:[%s166_s10 + $0x10] sm:$0xff]  ;;  %s306_s27 = sshll.u32 %s188_s26, 4  ;;  %s293_s9 = scalar_lea.sflag [#allocation4], %s709_s5  ;;  %s753_s27 = int_to_ptr.vmem [resolvable:$true] %s306_s27 }
  0x3a   : > { %259 = vperm.xlu0 %448, %v254_v1   ;;  %269 = vperm.xlu1 %449, %v256_v2   ;;  %v190_v5 = vld [vmem:[%s166_s10 + $0x8] sm:$0xff]  ;;  %v193_v6 = vld [vmem:[%s166_s10 + $0x20] sm:$0xff]  ;;  %v384_v7 = vmul.f32 -1.442695, %v189_v4  ;;  %v192_v13 = vld [vmem:[%s166_s10 + $0x18] sm:$0xff]  ;;  %v196_v36 = vshrl.u32 %v195_v32, 7  ;;  %s758_s8 = scalar_lea.hbm %s805_s3, %s396_s28 }
  0x3b   : > { %v194_v8 = vld [vmem:[%s166_s10 + $0x28] sm:$0xff]  ;;  %v385_v9 = vmul.f32 -1.442695, %v190_v5  ;;  %v388_v10 = vmul.f32 -1.442695, %v193_v6  ;;  %v278_v53 = vld [vmem:[%s804_s2] sm:$0xff] }
  0x3c   : > { %v389_v11 = vmul.f32 -1.442695, %v194_v8  ;;  %450 = vpow2.f32 %v384_v7  ;;  %v386_v14 = vmul.f32 -1.442695, %v191_v12  ;;  %v387_v15 = vmul.f32 -1.442695, %v192_v13 }
  0x3d   : > { %452 = vpow2.f32 %v385_v9  ;;  %v200_v16 = vmul.f32 1.442695, %v189_v4  ;;  %v202_v18 = vmul.f32 1.442695, %v190_v5  ;;  %v208_v20 = vmul.f32 1.442695, %v193_v6 }
  0x3e   : > { %264 = vperm.xlu0 %448, %v255_v3   ;;  %454 = vpow2.f32 %v388_v10  ;;  %v210_v22 = vmul.f32 1.442695, %v194_v8  ;;  %v204_v30 = vmul.f32 1.442695, %v191_v12  ;;  %v206_v31 = vmul.f32 1.442695, %v192_v13 }
  0x3f   : > { %456 = vpow2.f32 %v389_v11  ;;  %vm197_vm0 = vcmp.ge.s32.totalorder %v196_v36, 2  ;;  %vm198_vm1 = vcmp.lt.s32.totalorder %v196_v36, 4  ;;  %v279_v54 = vld [vmem:[%s804_s2 + $0x8] sm:$0xff]  ;;  %s516_s10 = scalar_lea.vmem %s753_s27, 768  ;;  %p813_p11 = scmp.ne.s32.totalorder %s808_s23, 0 }
  0x40   : > { %458 = vpow2.f32 %v386_v14  ;;  %vm728_vm2 = vmand %vm197_vm0, %vm198_vm1  ;;  %p517_p6 = scmp.ne.s32.totalorder %s753_s27, %s516_s10  ;;  %s588_s30 = smov [#allocation5]  }
  0x41   : > { %460 = vpow2.f32 %v387_v15  ;;  %s520_s4 = sshll.u32 %s588_s30, 4  ;;  %s521_s4 = int_to_ptr.vmem [resolvable:$false] %s520_s4 }
  0x42   : > { %462 = vpow2.f32 %v200_v16  ;;  %p518_p12 = pnand %p517_p6, %p813_p11  ;;  %s522_s6 = scalar_lea.vmem %s521_s4, 1536 }
  0x43   : > { %464 = vpow2.f32 %v202_v18  ;;  %p523_p8 = scmp.lt.s32.totalorder %s753_s27, %s521_s4  ;;  %p524_p10 = scmp.lt.s32.totalorder %s522_s6, %s516_s10 }
  0x44   : > { %466 = vpow2.f32 %v208_v20  ;;  %p519_p13 = pneg %p518_p12 }
  0x45   : > { %468 = vpow2.f32 %v210_v22  ;;  %p525_p0 = por %p524_p10, %p523_p8 }
  0x46   : > { %v451_v17 = vpop.eup %450 }
  0x47   : > { %v453_v19 = vpop.eup %452  ;;  %v230_v24 = vadd.f32 1.0, %v451_v17  ;;  %p526_p2 = pnand %p525_p0, %p519_p13 }
  0x48   : > { %v455_v21 = vpop.eup %454  ;;  %v231_v25 = vadd.f32 1.0, %v453_v19 }
  0x49   : > { %v457_v23 = vpop.eup %456  ;;  %v234_v26 = vadd.f32 1.0, %v455_v21  ;;  %470 = vrcp.f32 %v230_v24 }
  0x4a   : > { %v459_v27 = vpop.eup %458  ;;  %v235_v28 = vadd.f32 1.0, %v457_v23  ;;  %472 = vrcp.f32 %v231_v25 }
  0x4b   : > { %v461_v29 = vpop.eup %460  ;;  %474 = vrcp.f32 %v234_v26  ;;  %v232_v33 = vadd.f32 1.0, %v459_v27 }
  0x4c   : > { %476 = vrcp.f32 %v235_v28  ;;  %v233_v34 = vadd.f32 1.0, %v461_v29  ;;  %v463_v35 = vpop.eup %462 }
  0x4d   : > { %478 = vpow2.f32 %v204_v30  ;;  %v465_v37 = vpop.eup %464 }
  0x4e   : > { %480 = vpow2.f32 %v206_v31  ;;  %v467_v38 = vpop.eup %466 }
  0x4f   : > { %482 = vrcp.f32 %v232_v33  ;;  %v469_v39 = vpop.eup %468 }
  0x50   : > { %484 = vrcp.f32 %v233_v34 }
  0x53   : > { %v471_v40 = vpop.eup %470 }
  0x54   : > { %v473_v41 = vpop.eup %472  ;;  %v248_v48 = vsel %vm728_vm2, %v463_v35, %v471_v40 }
  0x55   : > { %v475_v42 = vpop.eup %474  ;;  %v249_v49 = vsel %vm728_vm2, %v465_v37, %v473_v41 }
  0x56   : > { %v477_v43 = vpop.eup %476  ;;  %v252_v50 = vsel %vm728_vm2, %v467_v38, %v475_v42 }
  0x57   : > { %v479_v45 = vpop.eup %478  ;;  %v253_v51 = vsel %vm728_vm2, %v469_v39, %v477_v43 }
  0x58   : > { %v481_v46 = vpop.eup %480 }
  0x59   : > { %v483_v47 = vpop.eup %482 }
  0x5a   : > { %v485_v52 = vpop.eup %484  ;;  %v250_v61 = vsel %vm728_vm2, %v479_v45, %v483_v47 }
  0x5b   : > { %v251_v62 = vsel %vm728_vm2, %v481_v46, %v485_v52 }
  0xb9   : > { %v260_v55 = vpop.permute.xlu0 %259  ;;  %v270_v56 = vpop.permute.xlu1 %269 }
  0xba   : > { %v272_v57 = vmul.f32 %v260_v55, %v248_v48  ;;  %v273_v58 = vmul.f32 %v260_v55, %v249_v49  ;;  %v276_v59 = vmul.f32 %v270_v56, %v252_v50  ;;  %v277_v60 = vmul.f32 %v270_v56, %v253_v51 }
  0xbc   : > { %v280_v63 = vadd.f32 %v278_v53, %v272_v57  ;;  %v281_v0 = vadd.f32 %v279_v54, %v273_v58  ;;  %v284_v1 = vadd.f32 %v278_v53, %v276_v59  ;;  %v285_v2 = vadd.f32 %v279_v54, %v277_v60 }
  0xbd   : > { %v265_v3 = vpop.permute.xlu0 %264 }
  0xbe   : > { %286 = vst [vmem:[%s188_s26] sm:$0xff] %v280_v63  ;;  %287 = vst [vmem:[%s188_s26 + $0x8] sm:$0xff] %v281_v0  ;;  %v274_v4 = vmul.f32 %v265_v3, %v250_v61  ;;  %v275_v5 = vmul.f32 %v265_v3, %v251_v62 }
  0xbf   : > { %290 = vst [vmem:[%s188_s26 + $0x20] sm:$0xff] %v284_v1  ;;  %291 = vst [vmem:[%s188_s26 + $0x28] sm:$0xff] %v285_v2 }
  0xc0   : > { %v282_v6 = vadd.f32 %v278_v53, %v274_v4  ;;  %v283_v7 = vadd.f32 %v279_v54, %v275_v5 }
  0xc2   : > { %288 = vst [vmem:[%s188_s26 + $0x10] sm:$0xff] %v282_v6  ;;  %289 = vst [vmem:[%s188_s26 + $0x18] sm:$0xff] %v283_v7 }
  0xc3   : > { %529 = shalt.err (!%p526_p2)
}
  0xc4   : > { %s530_s7 = scalar_lea.hbm %s758_s8, 768  ;;  %s534_s22 = scalar_lea.hbm %s805_s3, 1536 }
  0xc5   : > { %p531_p4 = scmp.ne.s32.totalorder %s758_s8, %s530_s7  ;;  %p535_p9 = scmp.lt.u32.totalorder %s758_s8, %s805_s3 }
  0xc6   : > { %p536_p1 = scmp.lt.u32.totalorder %s534_s22, %s530_s7  ;;  %p538_p6 = scmp.lt.u32.totalorder %s530_s7, %s758_s8 }
  0xc7   : > { %p532_p5 = pnand %p531_p4, %p813_p11 }
  0xc8   : > { %p537_p3 = por %p536_p1, %p535_p9 }
  0xc9   : > { %p533_p7 = pneg %p532_p5 }
  0xca   : > { %p539_p12 = por %p538_p6, %p537_p3 }
  0xcc   : > { %p540_p13 = pnand %p539_p12, %p533_p7 }
  0xce   : > { %543 = shalt.err (!%p540_p13)
}
  0xcf   : > { %s589_s25 = smov 256   ;;  %s590_s26 = smov 16  }
  0xd0   : > { %399 = dma.vmem_to_hbm [thread:$0]  (%p813_p11), %s753_s27, 768, %s758_s8, %s293_s9, %s589_s25, %s589_s25, %s590_s26  }
  0xd1 PF: > { %s321_s28 = sand.u32 1, %s570_s12   ;;  %p814_p8 = scmp.ne.s32.totalorder %s809_s24, 0 }
  0xd2   : > { %p815_p10 = scmp.ge.s32.totalorder %s582_s15, 2  ;;  %s322_s29 = scalar_lea.sflag [#allocation4], %s321_s28 }
  0xd4   : > { %p406_p0 = pnand %p815_p10, %p814_p8 }
  0xd6   : > { %565 = dma.done.wait (!%p406_p0), %s322_s29, 768  }
  0xd7   : > { %567 = vsyncadd (!%p406_p0), %s322_s29, 4294966528  ;;  %p16_p2 = scmp.ge.s32.totalorder %s636_s18, 4   ;;  %s816_s12 = smov %s574_s13 }
  0xd8   : > { %s817_s13 = smov %s578_s14  ;;  %s818_s14 = smov %s648_s21 }
  0xd9   : > { %s819_s15 = smov %s636_s18  ;;  %18 = sbr.rel (!%p16_p2) target bundleno = 5 (0x5), region = 77 }
  0xe0   :  { %327 = vsyncpa [#allocation3], 1 }
  0xe1   :  { %329 = vsyncpa [#allocation3 + $0x1], 1 }
  0xe2   :  { %330 = vsyncpa [#allocation4], 1 }
  0xe3   :  { %332 = vsyncpa [#allocation4 + $0x1], 1 }

</bundles_post_ra>
